<compile_context>
chip_gen: v7x
topology: tpu7x:2x2x1
jax: 0.10.0
libtpu: 0.0.40
codegen_flags: <defaults>
</compile_context>

<pallas_src>
import functools

import jax
import jax.numpy as jnp
from jax.experimental import pallas as pl
from jax.experimental.pallas import tpu as pltpu

_EPS = 1e-5                              # PyTorch InstanceNorm default
_BLOCK_BUDGET_BYTES = 6 * 1024 * 1024    # per x/out block; ~24-28 MiB pipelined
_VMEM_LIMIT_BYTES = 48 * 1024 * 1024     # safe on v5e/v6e (128 MiB) and v7x (64 MiB)


def _cond_instance_norm_kernel(x_ref, gamma_ref, beta_ref, o_ref):
    """x_ref/o_ref: (TN, TC, L); gamma_ref/beta_ref: (TN, TC, 1)."""
    x = x_ref[...].astype(jnp.float32)                   # f32 accumulation
    inv_l = jnp.float32(1.0 / x.shape[-1])

    # Single sweep: sum and sum-of-squares together (one VMEM read of x).
    s1 = jnp.sum(x, axis=-1, keepdims=True)              # (TN, TC, 1)
    s2 = jnp.sum(x * x, axis=-1, keepdims=True)
    mean = s1 * inv_l
    var = jnp.maximum(s2 * inv_l - mean * mean, 0.0)     # guard fp cancellation
    inv_std = jax.lax.rsqrt(var + _EPS)                  # EUP slot (cheap)

    g = gamma_ref[...].astype(jnp.float32)               # (TN, TC, 1), already f32
    b = beta_ref[...].astype(jnp.float32)
    scale = g * inv_std                                  # per-(n, c) coefficients
    shift = b - mean * scale
    o_ref[...] = (x * scale + shift).astype(o_ref.dtype)  # one FMA per element


def _pick_tiles(n, c, l, itemsize):
    """Choose (TN, TC) so a (TN, TC, L) block stays within the VMEM budget."""
    per_c = l * itemsize
    per_sample = c * per_c
    if per_sample <= _BLOCK_BUDGET_BYTES:
        # Full-C blocks: batch as many samples per grid step as the budget allows.
        tn = 1
        for d in range(1, n + 1):
            if n % d == 0 and d * per_sample <= _BLOCK_BUDGET_BYTES:
                tn = d
        return tn, c
    # Per-sample slab too large: tile channels (multiples of 8 keep the sublane
    # dim of the block aligned; normalization is over L only, so this is exact).
    tc = None
    for d in range(8, c, 8):
        if c % d == 0 and d * per_c <= _BLOCK_BUDGET_BYTES:
            tc = d
    if tc is None:
        # TODO(synk): for extremely large L add an "arbitrary" L grid axis with
        # scratch sum/sumsq accumulators instead of one oversized channel block.
        tc = c
    return 1, tc


@functools.partial(jax.jit, static_argnames=("bias",))
def conditional_instance_norm1d(x, y, embed_weight, *, bias=True):
    """x: (N, C, L) float, y: (N,) int32 class ids,
    embed_weight: (num_classes, 2*C) if bias else (num_classes, C)."""
    n, c, l = x.shape

    # Glue: embedding gather (table lookup) done in plain JAX.
    emb = jnp.take(embed_weight, y, axis=0)              # (N, 2C) or (N, C)
    if bias:
        gamma, beta = emb[:, :c], emb[:, c:]
    else:
        gamma, beta = emb, jnp.zeros_like(emb)
    # Keep affine params in float32 end-to-end (kernel computes in f32 anyway).
    gamma = gamma.reshape(n, c, 1).astype(jnp.float32)
    beta = beta.reshape(n, c, 1).astype(jnp.float32)

    itemsize = jnp.dtype(x.dtype).itemsize
    tn, tc = _pick_tiles(n, c, l, itemsize)
    grid = (n // tn, c // tc)

    cost = pl.CostEstimate(
        flops=6 * n * c * l,
        transcendentals=n * c,
        bytes_accessed=2 * n * c * l * itemsize + 4 * n * c * 4,
    )

    return pl.pallas_call(
        _cond_instance_norm_kernel,
        out_shape=jax.ShapeDtypeStruct((n, c, l), x.dtype),
        grid_spec=pltpu.PrefetchScalarGridSpec(
            num_scalar_prefetch=0,
            grid=grid,
            in_specs=[
                pl.BlockSpec((tn, tc, l), lambda i, j: (i, j, 0)),
                pl.BlockSpec((tn, tc, 1), lambda i, j: (i, j, 0)),
                pl.BlockSpec((tn, tc, 1), lambda i, j: (i, j, 0)),
            ],
            out_specs=pl.BlockSpec((tn, tc, l), lambda i, j: (i, j, 0)),
        ),
        compiler_params=pltpu.CompilerParams(
            dimension_semantics=("parallel", "parallel"),
            vmem_limit_bytes=_VMEM_LIMIT_BYTES,
        ),
        cost_estimate=cost,
    )(x, gamma, beta)


def _reference(x, y, embed_weight, bias=True):
    # Pure-JAX reference mirroring the PyTorch forward (two-pass stats).
    n, c, l = x.shape
    mean = jnp.mean(x, axis=-1, keepdims=True)
    var = jnp.mean((x - mean) ** 2, axis=-1, keepdims=True)
    h = (x - mean) / jnp.sqrt(var + _EPS)
    emb = embed_weight[y]
    if bias:
        gamma, beta = emb[:, :c], emb[:, c:]
    else:
        gamma, beta = emb, jnp.zeros((n, c), x.dtype)
    return gamma[:, :, None] * h + beta[:, :, None]


if __name__ == "__main__":
    num_features = 4     # C
    num_classes = 10
    N, L = 2, 128        # L multiple of 128 -> lane-dense output stores

    key = jax.random.PRNGKey(0)
    kx, kemb, ky = jax.random.split(key, 3)

    x = jax.random.normal(kx, (N, num_features, L), dtype=jnp.float32)
    y = jax.random.randint(ky, (N,), 0, num_classes, dtype=jnp.int32)

    # Deterministic parameter init matching the module's __init__:
    #   embed.weight[:, :C] ~ uniform[0, 1),  embed.weight[:, C:] = 0
    gamma_init = jax.random.uniform(kemb, (num_classes, num_features),
                                    dtype=jnp.float32)
    beta_init = jnp.zeros((num_classes, num_features), dtype=jnp.float32)
    embed_weight = jnp.concatenate([gamma_init, beta_init], axis=-1)

    out = conditional_instance_norm1d(x, y, embed_weight, bias=True)
    out = jax.block_until_ready(out)

    ref = _reference(x, y, embed_weight, bias=True)
    assert out.shape == (N, num_features, L)
    assert jnp.allclose(out, ref, atol=1e-5, rtol=1e-5), float(
        jnp.max(jnp.abs(out - ref)))

    print("KERNEL_OK")
</pallas_src>

<mosaic_0001>
module attributes {stable_mosaic.version = 11 : i64} {
  func.func @_cond_instance_norm_kernel(%arg0: i32, %arg1: i32, %arg2: memref<2x4x128xf32, #tpu.memory_space<vmem>>, %arg3: memref<2x4x1xf32, #tpu.memory_space<vmem>>, %arg4: memref<2x4x1xf32, #tpu.memory_space<vmem>>, %arg5: memref<2x4x128xf32, #tpu.memory_space<vmem>>) attributes {dimension_semantics = [#tpu.dimension_semantics<parallel>, #tpu.dimension_semantics<parallel>], iteration_bounds = array<i64: 1, 1>, scalar_prefetch = 0 : i64, scratch_operands = 0 : i64, tpu.core_type = #tpu.core_type<tc>, window_params = [{transform_indices = @transform_0, window_bounds = array<i64: 2, 4, 128>}, {transform_indices = @transform_1, window_bounds = array<i64: 2, 4, 1>}, {transform_indices = @transform_2, window_bounds = array<i64: 2, 4, 1>}, {transform_indices = @transform_3, window_bounds = array<i64: 2, 4, 128>}]} {
    %c0 = arith.constant 0 : index
    %c0_0 = arith.constant 0 : index
    %c0_1 = arith.constant 0 : index
    %0 = vector.load %arg2[%c0, %c0_0, %c0_1] : memref<2x4x128xf32, #tpu.memory_space<vmem>>, vector<2x4x128xf32>
    %cst = arith.constant dense<0.000000e+00> : vector<2x4xf32>
    %1 = vector.multi_reduction <add>, %0, %cst [2] : vector<2x4x128xf32> to vector<2x4xf32>
    %2 = vector.shape_cast %1 : vector<2x4xf32> to vector<2x4x1xf32>
    %3 = arith.mulf %0, %0 : vector<2x4x128xf32>
    %cst_2 = arith.constant dense<0.000000e+00> : vector<2x4xf32>
    %4 = vector.multi_reduction <add>, %3, %cst_2 [2] : vector<2x4x128xf32> to vector<2x4xf32>
    %5 = vector.shape_cast %4 : vector<2x4xf32> to vector<2x4x1xf32>
    %cst_3 = arith.constant 7.812500e-03 : f32
    %6 = vector.broadcast %cst_3 : f32 to vector<2x4x1xf32>
    %7 = arith.mulf %2, %6 : vector<2x4x1xf32>
    %cst_4 = arith.constant 7.812500e-03 : f32
    %8 = vector.broadcast %cst_4 : f32 to vector<2x4x1xf32>
    %9 = arith.mulf %5, %8 : vector<2x4x1xf32>
    %10 = arith.mulf %7, %7 : vector<2x4x1xf32>
    %11 = arith.subf %9, %10 : vector<2x4x1xf32>
    %cst_5 = arith.constant 0.000000e+00 : f32
    %12 = vector.broadcast %cst_5 : f32 to vector<2x4x1xf32>
    %13 = arith.maximumf %11, %12 : vector<2x4x1xf32>
    %cst_6 = arith.constant 9.99999974E-6 : f32
    %14 = vector.broadcast %cst_6 : f32 to vector<2x4x1xf32>
    %15 = arith.addf %13, %14 : vector<2x4x1xf32>
    %16 = math.rsqrt %15 : vector<2x4x1xf32>
    %c0_7 = arith.constant 0 : index
    %c0_8 = arith.constant 0 : index
    %c0_9 = arith.constant 0 : index
    %17 = vector.load %arg3[%c0_7, %c0_8, %c0_9] : memref<2x4x1xf32, #tpu.memory_space<vmem>>, vector<2x4x1xf32>
    %c0_10 = arith.constant 0 : index
    %c0_11 = arith.constant 0 : index
    %c0_12 = arith.constant 0 : index
    %18 = vector.load %arg4[%c0_10, %c0_11, %c0_12] : memref<2x4x1xf32, #tpu.memory_space<vmem>>, vector<2x4x1xf32>
    %19 = arith.mulf %17, %16 : vector<2x4x1xf32>
    %20 = arith.mulf %7, %19 : vector<2x4x1xf32>
    %21 = arith.subf %18, %20 : vector<2x4x1xf32>
    %22 = vector.broadcast %19 : vector<2x4x1xf32> to vector<2x4x128xf32>
    %23 = arith.mulf %0, %22 : vector<2x4x128xf32>
    %24 = vector.broadcast %21 : vector<2x4x1xf32> to vector<2x4x128xf32>
    %25 = arith.addf %23, %24 : vector<2x4x128xf32>
    %c0_13 = arith.constant 0 : index
    %c0_14 = arith.constant 0 : index
    %c0_15 = arith.constant 0 : index
    %26 = vector.load %arg5[%c0_13, %c0_14, %c0_15] : memref<2x4x128xf32, #tpu.memory_space<vmem>>, vector<2x4x128xf32>
    tpu.vector_store %arg5[%c0_13, %c0_14, %c0_15], %25 {strides = array<i32>} : memref<2x4x128xf32, #tpu.memory_space<vmem>>, vector<2x4x128xf32>,
    return
  }
  func.func @transform_0(%arg0: i32, %arg1: i32) -> (i32, i32, i32) {
    %c0_i32 = arith.constant 0 : i32
    %c0_i32_0 = arith.constant 0 : i32
    return %arg0, %arg1, %c0_i32 : i32, i32, i32
  }
  func.func @transform_1(%arg0: i32, %arg1: i32) -> (i32, i32, i32) {
    %c0_i32 = arith.constant 0 : i32
    %c0_i32_0 = arith.constant 0 : i32
    return %arg0, %arg1, %c0_i32 : i32, i32, i32
  }
  func.func @transform_2(%arg0: i32, %arg1: i32) -> (i32, i32, i32) {
    %c0_i32 = arith.constant 0 : i32
    %c0_i32_0 = arith.constant 0 : i32
    return %arg0, %arg1, %c0_i32 : i32, i32, i32
  }
  func.func @transform_3(%arg0: i32, %arg1: i32) -> (i32, i32, i32) {
    %c0_i32 = arith.constant 0 : i32
    %c0_i32_0 = arith.constant 0 : i32
    return %arg0, %arg1, %c0_i32 : i32, i32, i32
  }
}

</mosaic_0001>

<bundles_post_ra>
// kernel: conditional_instance_norm1d.1
= control target key start
LH: loop header
LB: loop body
LE: loop exit
PB: predicated region body
PF: predicated region fallthrough
CT: control target
= control target key end

     0   :  { %vm17_vm0 = vcmask 1043456   ;;  %s186_s0 = inlined_call_operand.vmem [shape: f32[2,4,128], index: 0, kind: input, shape index: {}]   ;;  %s187_s1 = inlined_call_operand.vmem [shape: f32[2,4,1], index: 1, kind: input, shape index: {}]   ;;  %s188_s2 = inlined_call_operand.vmem [shape: f32[2,4,1], index: 2, kind: input, shape index: {}]   ;;  %s189_s3 = inlined_call_operand.hbm [shape: f32[2,4,128], index: 3, kind: output, shape index: {}]  }
   0x1   :  { %v15_v0 = vld [vmem:[%s186_s0] sm:$0xf]  ;;  %v16_v1 = vld [vmem:[%s186_s0 + $0x4] sm:$0xf] }
   0x2   :  { %v18_v2 = vsel %vm17_vm0, %v15_v0, 0.0  ;;  %v24_v3 = vmul.f32 %v15_v0, %v15_v0  ;;  %v25_v4 = vmul.f32 %v16_v1, %v16_v1 }
   0x3   :  { %8 = vsyncpa [#allocation3], 0  ;;  %19 = vadd.xlane.f32.xlu0 %v18_v2  ;;  %v21_v6 = vsel %vm17_vm0, %v16_v1, 0.0  ;;  %v132_v8 = vmov 0   ;;  %v46_v25 = vld [vmem:[%s187_s1] sm:$0xf] }
   0x4   :  { %v26_v5 = vsel %vm17_vm0, %v24_v3, 0.0  ;;  %v29_v7 = vsel %vm17_vm0, %v25_v4, 0.0  ;;  %102 = vset.pattern.permute.xlu0 %v132_v8  ;;  %103 = vset.pattern.permute.xlu1 %v132_v8  ;;  %v47_v28 = vld [vmem:[%s187_s1 + $0x4] sm:$0xf]  ;;  %v48_v32 = vld [vmem:[%s188_s2] sm:$0xf] }
   0x5   :  { %27 = vadd.xlane.f32.xlu1 %v26_v5  ;;  %v49_v35 = vld [vmem:[%s188_s2 + $0x4] sm:$0xf]  ;;  %s133_s1 = smov [#allocation2]  }
   0x6   :  { %s87_s23 = sshll.u32 %s133_s1, 4  ;;  %s88_s23 = int_to_ptr.vmem [resolvable:$true] %s87_s23 }
   0x7   :  { %22 = vadd.xlane.f32.xlu0 %v21_v6  ;;  %s108_s24 = scalar_lea.vmem %s88_s23, 128  ;;  %p113_p1 = scmp.lt.s32.totalorder %s88_s23, %s88_s23 }
   0x8   :  { %p109_p0 = scmp.ne.s32.totalorder %s88_s23, %s108_s24  ;;  %p114_p2 = scmp.lt.s32.totalorder %s108_s24, %s108_s24 }
   0x9   :  { %30 = vadd.xlane.f32.xlu1 %v29_v7 }
   0xa   :  { %p115_p3 = por %p114_p2, %p113_p1 }
   0xc   :  { %p116_p4 = pnand %p115_p3, %p109_p0 }
  0x90   :  { %v20_v9 = vpop.xlane.xlu0 %19 }
  0x91   :  { %v32_v10 = vmul.f32 0.0078125, %v20_v9 }
  0x92   :  { %v28_v11 = vpop.xlane.xlu1 %27 }
  0x93   :  { %v36_v12 = vmul.f32 %v32_v10, %v32_v10  ;;  %v34_v13 = vmul.f32 0.0078125, %v28_v11 }
  0x94   :  { %v23_v14 = vpop.xlane.xlu0 %22 }
  0x95   :  { %v38_v15 = vsub.f32 %v34_v13, %v36_v12  ;;  %v33_v16 = vmul.f32 0.0078125, %v23_v14 }
  0x96   :  { %v31_v17 = vpop.xlane.xlu1 %30 }
  0x97   :  { %v40_v18 = vmax.f32 %v38_v15, 0.0  ;;  %v37_v19 = vmul.f32 %v33_v16, %v33_v16  ;;  %v35_v20 = vmul.f32 0.0078125, %v31_v17 }
  0x99   :  { %v42_v21 = vadd.f32 1e-05, %v40_v18  ;;  %v39_v22 = vsub.f32 %v35_v20, %v37_v19 }
  0x9b   :  { %104 = vrsqrt.f32 %v42_v21  ;;  %v41_v23 = vmax.f32 %v39_v22, 0.0 }
  0x9d   :  { %v43_v24 = vadd.f32 1e-05, %v41_v23 }
  0x9f   :  { %106 = vrsqrt.f32 %v43_v24 }
  0xa5   :  { %v105_v26 = vpop.eup %104 }
  0xa6   :  { %v50_v27 = vmul.f32 %v105_v26, %v46_v25 }
  0xa8   :  { %58 = vperm.xlu0 %102, %v50_v27   ;;  %v52_v31 = vmul.f32 %v50_v27, %v32_v10 }
  0xa9   :  { %v107_v29 = vpop.eup %106 }
  0xaa   :  { %v51_v30 = vmul.f32 %v107_v29, %v47_v28  ;;  %v54_v33 = vsub.f32 %v48_v32, %v52_v31 }
  0xac   :  { %63 = vperm.xlu1 %103, %v51_v30   ;;  %v53_v34 = vmul.f32 %v51_v30, %v33_v16 }
  0xae   :  { %v55_v36 = vsub.f32 %v49_v35, %v53_v34 }
  0xb0   :  { %70 = vperm.xlu1 %103, %v54_v33  }
  0xb4   :  { %75 = vperm.xlu1 %103, %v55_v36  }
 0x127   :  { %v59_v37 = vpop.permute.xlu0 %58 }
 0x128   :  { %v66_v39 = vmul.f32 %v59_v37, %v15_v0 }
 0x12b   :  { %v64_v38 = vpop.permute.xlu1 %63 }
 0x12c   :  { %v67_v42 = vmul.f32 %v64_v38, %v16_v1 }
 0x12f   :  { %v71_v40 = vpop.permute.xlu1 %70 }
 0x130   :  { %v78_v41 = vadd.f32 %v71_v40, %v66_v39 }
 0x132   :  { %80 = vst [vmem:[#allocation2] sm:$0xf] %v78_v41 }
 0x133   :  { %v76_v43 = vpop.permute.xlu1 %75 }
 0x134   :  { %v79_v44 = vadd.f32 %v76_v43, %v67_v42 }
 0x136   :  { %81 = vst [vmem:[#allocation2 + $0x4] sm:$0xf] %v79_v44 }
 0x137   :  { %119 = shalt.err (!%p116_p4)
}
 0x138   :  { %s120_s26 = scalar_lea.hbm %s189_s3, 128 }
 0x139   :  { %p121_p5 = scmp.ne.s32.totalorder %s189_s3, %s120_s26  ;;  %p124_p6 = scmp.lt.u32.totalorder %s120_s26, %s189_s3 }
 0x13b   :  { %p126_p7 = pnand %p124_p6, %p121_p5 }
 0x13d   :  { %129 = shalt.err (!%p126_p7)
}
 0x13e   :  { %s134_s4 = smov 64   ;;  %s135_s5 = smov 4  }
 0x13f   :  { %93 = dma.vmem_to_hbm [thread:$0]  %s88_s23, 128, %s189_s3, [#allocation3], %s134_s4, %s134_s4, %s135_s5  }
 0x140   :  { %130 = dma.done.wait [#allocation3], 128  }
 0x141   :  { %131 = vsyncadd [#allocation3], 4294967168 }
 0x142   :  { %97 = vsyncpa [#allocation3], 1 }

</bundles_post_ra>
